<compile_context>
chip_gen: v5e
topology: v5e:2x2
jax: 0.10.0
libtpu: 0.0.40
codegen_flags: <defaults>
</compile_context>

<pallas_src>
import functools

import jax
import jax.numpy as jnp
from jax.experimental import pallas as pl
from jax.experimental.pallas import tpu as pltpu

LN_EPS = 1e-6
# GeLU: tanh approximation (BERT-style custom GeLU used by this codebase).
_SQRT_2_OVER_PI = 0.7978845608028654


def _round_up(n, m):
    return ((n + m - 1) // m) * m


def _gelu_f32(h):
    # tanh lands on the EUP slot, hidden under MXU work.
    return 0.5 * h * (1.0 + jnp.tanh(_SQRT_2_OVER_PI * (h + 0.044715 * (h * h) * h)))


def _physical_vmem_bytes():
    """Per-core physical VMEM; conservative (v7x) fallback if query fails."""
    try:
        info = pltpu.get_tpu_info()
        cap = getattr(info, "vmem_capacity_bytes", None)
        if cap:
            return int(cap)
    except Exception:
        pass
    return 64 * 1024 * 1024


def _vmem_need_bytes(tm, tf, d, x_itemsize, c_itemsize):
    """Approximate VMEM footprint for one (tm, tf) configuration."""
    w_blocks = 2 * (d * tf + tf + tf * d) * c_itemsize      # W1/b1/W2, double-buffered
    consts = 2 * 3 * d * 4                                  # ln_w, ln_b, b2
    io = 2 * 2 * tm * d * x_itemsize                        # x + out blocks, 2 bufs each
    scratch = tm * d * (c_itemsize + 4)                     # cached xn + f32 accumulator
    temps = tm * tf * (4 + c_itemsize) + 3 * tm * d * 4     # h (f32 + cast copy) + LN temps
    return w_blocks + consts + io + scratch + temps


def _ffn_kernel(x_ref, ln_w_ref, ln_b_ref, w1_ref, b1_ref, w2_ref, b2_ref,
                o_ref, xn_ref, acc_ref, *, compute_dtype):
    f = pl.program_id(1)
    nf = pl.num_programs(1)

    # f == 0: LayerNorm once per row tile; cache normalized rows (compute
    # dtype) and zero the f32 accumulator.
    @pl.when(f == 0)
    def _():
        xf = x_ref[...].astype(jnp.float32)
        mu = jnp.mean(xf, axis=-1, keepdims=True)
        xc = xf - mu
        var = jnp.mean(xc * xc, axis=-1, keepdims=True)
        xn = xc * jax.lax.rsqrt(var + LN_EPS)
        xn = xn * ln_w_ref[...].astype(jnp.float32) + ln_b_ref[...].astype(jnp.float32)
        xn_ref[...] = xn.astype(xn_ref.dtype)
        acc_ref[...] = jnp.zeros_like(acc_ref)

    # Linear 1 (D -> tf) on the MXU: both operands compute_dtype, f32 accumulate.
    h = jnp.dot(xn_ref[...], w1_ref[...].astype(compute_dtype),
                preferred_element_type=jnp.float32)
    h = h + b1_ref[...].astype(jnp.float32)

    # GeLU in f32 (safe on all generations; elementwise over the F chunk).
    h = _gelu_f32(h)
    # (Dropout: identity in eval mode.)

    # Linear 2 partial product (tf -> D), accumulated in f32 scratch.
    acc_ref[...] += jnp.dot(h.astype(compute_dtype),
                            w2_ref[...].astype(compute_dtype),
                            preferred_element_type=jnp.float32)

    # f == last: output bias + residual (re-read the resident x block), store.
    @pl.when(f == nf - 1)
    def _():
        y = acc_ref[...] + b2_ref[...].astype(jnp.float32)
        o_ref[...] = (y + x_ref[...].astype(jnp.float32)).astype(o_ref.dtype)


def positionwise_feed_forward(x, params, *, compute_dtype=jnp.bfloat16,
                              tile_rows=512, max_f_tile=2048):
    """x: [B, S, D] -> [B, S, D].

    compute_dtype: MXU operand dtype (bf16 default = full MXU rate, f32
    accumulation).  Pass jnp.float32 for exact mode.
    """
    B, S, D = x.shape
    N = B * S
    x_dtype = x.dtype

    # Accept rank-1 or rank-2 LN/bias parameters.
    ln_w = jnp.asarray(params["ln_w"]).reshape(1, D)
    ln_b = jnp.asarray(params["ln_b"]).reshape(1, D)
    w1 = jnp.asarray(params["w1"]).astype(compute_dtype)
    b1 = jnp.asarray(params["b1"]).reshape(1, -1).astype(compute_dtype)
    w2 = jnp.asarray(params["w2"]).astype(compute_dtype)
    b2 = jnp.asarray(params["b2"]).reshape(1, D).astype(compute_dtype)
    F = w1.shape[1]

    c_itemsize = jnp.dtype(compute_dtype).itemsize
    x_itemsize = jnp.dtype(x_dtype).itemsize

    # ---- tile selection ----------------------------------------------------
    # Rows: multiple of 16 covers f32(8) and bf16(16) sublane tiling.
    tm = min(tile_rows, _round_up(N, 16))
    tm = max(16, _round_up(tm, 16))
    # Prefer >=2 row tiles so both TensorCores get work under "parallel".
    if tm >= 32 and _round_up(N, tm) // tm < 2:
        tm = max(16, _round_up((N + 1) // 2, 16))

    # F chunk: lane-aligned (128); shrink tm/tf until footprint fits VMEM.
    tf = min(_round_up(F, 128), _round_up(max_f_tile, 128))
    budget = int(0.85 * _physical_vmem_bytes())
    while _vmem_need_bytes(tm, tf, D, x_itemsize, c_itemsize) > budget:
        if tf > 128:
            tf = max(128, tf // 2)
        elif tm > 16:
            tm = max(16, _round_up(tm // 2, 16))
        else:
            break

    n_pad = _round_up(N, tm)
    f_pad = _round_up(F, tf)

    # ---- padding -----------------------------------------------------------
    # Zero rows are LN-safe (rsqrt(eps) finite) and are sliced off.  Zero F
    # columns give GeLU(0)=0 and zero W2 rows, so they contribute nothing.
    x2d = x.reshape(N, D)
    if n_pad != N:
        x2d = jnp.pad(x2d, ((0, n_pad - N), (0, 0)))
    if f_pad != F:
        w1 = jnp.pad(w1, ((0, 0), (0, f_pad - F)))
        b1 = jnp.pad(b1, ((0, 0), (0, f_pad - F)))
        w2 = jnp.pad(w2, ((0, f_pad - F), (0, 0)))

    need = _vmem_need_bytes(tm, tf, D, x_itemsize, c_itemsize)
    vmem_limit = int(min(max(1.3 * need, 32 * 1024 * 1024),
                         0.9 * _physical_vmem_bytes()))

    grid = (n_pad // tm, f_pad // tf)
    kernel = functools.partial(_ffn_kernel, compute_dtype=compute_dtype)

    out = pl.pallas_call(
        kernel,
        out_shape=jax.ShapeDtypeStruct((n_pad, D), x_dtype),
        grid_spec=pltpu.PrefetchScalarGridSpec(
            num_scalar_prefetch=0,
            grid=grid,
            in_specs=[
                pl.BlockSpec((tm, D), lambda i, f: (i, 0)),    # x rows
                pl.BlockSpec((1, D), lambda i, f: (0, 0)),     # ln weight
                pl.BlockSpec((1, D), lambda i, f: (0, 0)),     # ln bias
                pl.BlockSpec((D, tf), lambda i, f: (0, f)),    # W1 chunk
                pl.BlockSpec((1, tf), lambda i, f: (0, f)),    # b1 chunk
                pl.BlockSpec((tf, D), lambda i, f: (f, 0)),    # W2 chunk
                pl.BlockSpec((1, D), lambda i, f: (0, 0)),     # b2
            ],
            out_specs=pl.BlockSpec((tm, D), lambda i, f: (i, 0)),
            scratch_shapes=[
                pltpu.VMEM((tm, D), compute_dtype),   # cached normalized rows
                pltpu.VMEM((tm, D), jnp.float32),     # f32 accumulator
            ],
        ),
        compiler_params=pltpu.CompilerParams(
            dimension_semantics=("parallel", "arbitrary"),
            vmem_limit_bytes=vmem_limit,
        ),
    )(x2d, ln_w, ln_b, w1, b1, w2, b2)

    if n_pad != N:
        out = out[:N]
    return out.reshape(B, S, D)


def init_params(key, input_size, ff_size, dtype=jnp.float32):
    k1, k2, k3, k4 = jax.random.split(key, 4)
    s1 = 1.0 / jnp.sqrt(jnp.float32(input_size))
    s2 = 1.0 / jnp.sqrt(jnp.float32(ff_size))
    return {
        "ln_w": jnp.ones((input_size,), dtype),
        "ln_b": jnp.zeros((input_size,), dtype),
        "w1": (jax.random.uniform(k1, (input_size, ff_size), jnp.float32,
                                  -1.0, 1.0) * s1).astype(dtype),
        "b1": (jax.random.uniform(k2, (ff_size,), jnp.float32,
                                  -1.0, 1.0) * s1).astype(dtype),
        "w2": (jax.random.uniform(k3, (ff_size, input_size), jnp.float32,
                                  -1.0, 1.0) * s2).astype(dtype),
        "b2": (jax.random.uniform(k4, (input_size,), jnp.float32,
                                  -1.0, 1.0) * s2).astype(dtype),
    }


def _reference(x, p):
    """Pure-JAX reference of the same forward pass (computed in f32)."""
    xf = x.astype(jnp.float32)
    mu = jnp.mean(xf, axis=-1, keepdims=True)
    var = jnp.mean((xf - mu) ** 2, axis=-1, keepdims=True)
    xn = (xf - mu) / jnp.sqrt(var + LN_EPS)
    xn = xn * p["ln_w"].astype(jnp.float32) + p["ln_b"].astype(jnp.float32)
    h = xn @ p["w1"].astype(jnp.float32) + p["b1"].astype(jnp.float32)
    h = _gelu_f32(h)
    y = h @ p["w2"].astype(jnp.float32) + p["b2"].astype(jnp.float32)
    return (y + xf).astype(x.dtype)


if __name__ == "__main__":
    # Small but lane-dense shapes (D = 128 lanes) to validate layout paths.
    B, S, D, FF = 2, 8, 128, 256

    key = jax.random.PRNGKey(0)
    kx, kp, kx2 = jax.random.split(key, 3)
    x = jax.random.normal(kx, (B, S, D), jnp.float32)
    params = init_params(kp, D, FF, dtype=jnp.float32)
    ref = _reference(x, params)

    # 1) Exact mode (f32 MXU operands) — tight tolerance vs reference.
    out = jax.block_until_ready(
        positionwise_feed_forward(x, params, compute_dtype=jnp.float32))
    assert out.shape == (B, S, D)
    assert jnp.allclose(out, ref, atol=1e-3, rtol=1e-3), "f32 mismatch vs reference"

    # 2) Default bf16 fast path (bf16 MXU operands, f32 accumulation).
    out_bf = jax.block_until_ready(positionwise_feed_forward(x, params))
    assert out_bf.shape == (B, S, D)
    assert jnp.allclose(out_bf.astype(jnp.float32), ref, atol=1e-1, rtol=1e-1), \
        "bf16 mismatch vs reference"

    # 3) Exercise the F-tiled accumulator, ragged-row padding and multiple
    #    row tiles (S=9 -> N=18 padded to 32; max_f_tile=128 -> 2 F chunks).
    x2 = jax.random.normal(kx2, (2, 9, D), jnp.float32)
    ref2 = _reference(x2, params)
    out2 = jax.block_until_ready(
        positionwise_feed_forward(x2, params, compute_dtype=jnp.float32,
                                  tile_rows=16, max_f_tile=128))
    assert out2.shape == x2.shape
    assert jnp.allclose(out2, ref2, atol=1e-3, rtol=1e-3), "F-tiled mismatch vs reference"

    print("KERNEL_OK")
</pallas_src>

<mosaic_0001>
module attributes {stable_mosaic.version = 11 : i64} {
  func.func @_ffn_kernel(%arg0: i32, %arg1: i32, %arg2: memref<16x128xf32, #tpu.memory_space<vmem>>, %arg3: memref<1x128xf32, #tpu.memory_space<vmem>>, %arg4: memref<1x128xf32, #tpu.memory_space<vmem>>, %arg5: memref<128x256xf32, #tpu.memory_space<vmem>>, %arg6: memref<1x256xf32, #tpu.memory_space<vmem>>, %arg7: memref<256x128xf32, #tpu.memory_space<vmem>>, %arg8: memref<1x128xf32, #tpu.memory_space<vmem>>, %arg9: memref<16x128xf32, #tpu.memory_space<vmem>>, %arg10: memref<16x128xf32, #tpu.memory_space<vmem>>, %arg11: memref<16x128xf32, #tpu.memory_space<vmem>>) attributes {dimension_semantics = [#tpu.dimension_semantics<parallel>, #tpu.dimension_semantics<arbitrary>], iteration_bounds = array<i64: 1, 1>, scalar_prefetch = 0 : i64, scratch_operands = 2 : i64, tpu.core_type = #tpu.core_type<tc>, window_params = [{transform_indices = @transform_0, window_bounds = array<i64: 16, 128>}, {pipeline_mode = #tpu.pipeline_mode<synchronous>, transform_indices = @transform_1, window_bounds = array<i64: 1, 128>}, {pipeline_mode = #tpu.pipeline_mode<synchronous>, transform_indices = @transform_2, window_bounds = array<i64: 1, 128>}, {transform_indices = @transform_3, window_bounds = array<i64: 128, 256>}, {transform_indices = @transform_4, window_bounds = array<i64: 1, 256>}, {transform_indices = @transform_5, window_bounds = array<i64: 256, 128>}, {pipeline_mode = #tpu.pipeline_mode<synchronous>, transform_indices = @transform_6, window_bounds = array<i64: 1, 128>}, {transform_indices = @transform_7, window_bounds = array<i64: 16, 128>}]} {
    %c0_i32 = arith.constant 0 : i32
    %0 = arith.cmpi eq, %arg1, %c0_i32 : i32
    %1 = arith.extui %0 : i1 to i32
    %c0_i32_0 = arith.constant 0 : i32
    %2 = arith.cmpi ne, %1, %c0_i32_0 : i32
    scf.if %2 {
      %c0_19 = arith.constant 0 : index
      %c0_20 = arith.constant 0 : index
      %30 = vector.load %arg2[%c0_19, %c0_20] : memref<16x128xf32, #tpu.memory_space<vmem>>, vector<16x128xf32>
      %cst_21 = arith.constant dense<0.000000e+00> : vector<16xf32>
      %31 = vector.multi_reduction <add>, %30, %cst_21 [1] : vector<16x128xf32> to vector<16xf32>
      %32 = vector.shape_cast %31 : vector<16xf32> to vector<16x1xf32>
      %cst_22 = arith.constant 1.280000e+02 : f32
      %33 = vector.broadcast %cst_22 : f32 to vector<16x1xf32>
      %34 = arith.divf %32, %33 : vector<16x1xf32>
      %35 = vector.broadcast %34 : vector<16x1xf32> to vector<16x128xf32>
      %36 = arith.subf %30, %35 : vector<16x128xf32>
      %37 = arith.mulf %36, %36 : vector<16x128xf32>
      %cst_23 = arith.constant dense<0.000000e+00> : vector<16xf32>
      %38 = vector.multi_reduction <add>, %37, %cst_23 [1] : vector<16x128xf32> to vector<16xf32>
      %39 = vector.shape_cast %38 : vector<16xf32> to vector<16x1xf32>
      %cst_24 = arith.constant 1.280000e+02 : f32
      %40 = vector.broadcast %cst_24 : f32 to vector<16x1xf32>
      %41 = arith.divf %39, %40 : vector<16x1xf32>
      %cst_25 = arith.constant 9.99999997E-7 : f32
      %42 = vector.broadcast %cst_25 : f32 to vector<16x1xf32>
      %43 = arith.addf %41, %42 : vector<16x1xf32>
      %44 = math.rsqrt %43 : vector<16x1xf32>
      %45 = vector.broadcast %44 : vector<16x1xf32> to vector<16x128xf32>
      %46 = arith.mulf %36, %45 : vector<16x128xf32>
      %c0_26 = arith.constant 0 : index
      %c0_27 = arith.constant 0 : index
      %47 = vector.load %arg3[%c0_26, %c0_27] : memref<1x128xf32, #tpu.memory_space<vmem>>, vector<1x128xf32>
      %48 = vector.broadcast %47 : vector<1x128xf32> to vector<16x128xf32>
      %49 = arith.mulf %46, %48 : vector<16x128xf32>
      %c0_28 = arith.constant 0 : index
      %c0_29 = arith.constant 0 : index
      %50 = vector.load %arg4[%c0_28, %c0_29] : memref<1x128xf32, #tpu.memory_space<vmem>>, vector<1x128xf32>
      %51 = vector.broadcast %50 : vector<1x128xf32> to vector<16x128xf32>
      %52 = arith.addf %49, %51 : vector<16x128xf32>
      %c0_30 = arith.constant 0 : index
      %c0_31 = arith.constant 0 : index
      %53 = vector.load %arg10[%c0_30, %c0_31] : memref<16x128xf32, #tpu.memory_space<vmem>>, vector<16x128xf32>
      tpu.vector_store %arg10[%c0_30, %c0_31], %52 {strides = array<i32>} : memref<16x128xf32, #tpu.memory_space<vmem>>, vector<16x128xf32>,
      %cst_32 = arith.constant 0.000000e+00 : f32
      %54 = vector.broadcast %cst_32 : f32 to vector<16x128xf32>
      %c0_33 = arith.constant 0 : index
      %c0_34 = arith.constant 0 : index
      %55 = vector.load %arg11[%c0_33, %c0_34] : memref<16x128xf32, #tpu.memory_space<vmem>>, vector<16x128xf32>
      tpu.vector_store %arg11[%c0_33, %c0_34], %54 {strides = array<i32>} : memref<16x128xf32, #tpu.memory_space<vmem>>, vector<16x128xf32>,
    } else {
    }
    %c0 = arith.constant 0 : index
    %c0_1 = arith.constant 0 : index
    %3 = vector.load %arg10[%c0, %c0_1] : memref<16x128xf32, #tpu.memory_space<vmem>>, vector<16x128xf32>
    %c0_2 = arith.constant 0 : index
    %c0_3 = arith.constant 0 : index
    %4 = vector.load %arg5[%c0_2, %c0_3] : memref<128x256xf32, #tpu.memory_space<vmem>>, vector<128x256xf32>
    %cst = arith.constant dense<0.000000e+00> : vector<16x256xf32>
    %5 = tpu.matmul %3, %4, %cst {dimension_numbers = #tpu.dot_dimension_numbers<[1], [0], [0], [1], [0, 0, 1, 1], [], []>} : vector<16x128xf32>, vector<128x256xf32>, vector<16x256xf32> -> vector<16x256xf32>
    %c0_4 = arith.constant 0 : index
    %c0_5 = arith.constant 0 : index
    %6 = vector.load %arg6[%c0_4, %c0_5] : memref<1x256xf32, #tpu.memory_space<vmem>>, vector<1x256xf32>
    %7 = vector.broadcast %6 : vector<1x256xf32> to vector<16x256xf32>
    %8 = arith.addf %5, %7 : vector<16x256xf32>
    %cst_6 = arith.constant 5.000000e-01 : f32
    %9 = vector.broadcast %cst_6 : f32 to vector<16x256xf32>
    %10 = arith.mulf %9, %8 : vector<16x256xf32>
    %11 = arith.mulf %8, %8 : vector<16x256xf32>
    %cst_7 = arith.constant 4.471500e-02 : f32
    %12 = vector.broadcast %cst_7 : f32 to vector<16x256xf32>
    %13 = arith.mulf %12, %11 : vector<16x256xf32>
    %14 = arith.mulf %13, %8 : vector<16x256xf32>
    %15 = arith.addf %8, %14 : vector<16x256xf32>
    %cst_8 = arith.constant 0.797884583 : f32
    %16 = vector.broadcast %cst_8 : f32 to vector<16x256xf32>
    %17 = arith.mulf %16, %15 : vector<16x256xf32>
    %18 = math.tanh %17 : vector<16x256xf32>
    %cst_9 = arith.constant 1.000000e+00 : f32
    %19 = vector.broadcast %cst_9 : f32 to vector<16x256xf32>
    %20 = arith.addf %19, %18 : vector<16x256xf32>
    %21 = arith.mulf %10, %20 : vector<16x256xf32>
    %c0_10 = arith.constant 0 : index
    %c0_11 = arith.constant 0 : index
    %22 = vector.load %arg11[%c0_10, %c0_11] : memref<16x128xf32, #tpu.memory_space<vmem>>, vector<16x128xf32>
    %c0_12 = arith.constant 0 : index
    %c0_13 = arith.constant 0 : index
    %23 = vector.load %arg7[%c0_12, %c0_13] : memref<256x128xf32, #tpu.memory_space<vmem>>, vector<256x128xf32>
    %cst_14 = arith.constant dense<0.000000e+00> : vector<16x128xf32>
    %24 = tpu.matmul %21, %23, %cst_14 {dimension_numbers = #tpu.dot_dimension_numbers<[1], [0], [0], [1], [0, 0, 1, 1], [], []>} : vector<16x256xf32>, vector<256x128xf32>, vector<16x128xf32> -> vector<16x128xf32>
    %25 = arith.addf %22, %24 : vector<16x128xf32>
    %c0_15 = arith.constant 0 : index
    %c0_16 = arith.constant 0 : index
    %26 = vector.load %arg11[%c0_15, %c0_16] : memref<16x128xf32, #tpu.memory_space<vmem>>, vector<16x128xf32>
    tpu.vector_store %arg11[%c0_15, %c0_16], %25 {strides = array<i32>} : memref<16x128xf32, #tpu.memory_space<vmem>>, vector<16x128xf32>,
    %c0_i32_17 = arith.constant 0 : i32
    %27 = arith.cmpi eq, %arg1, %c0_i32_17 : i32
    %28 = arith.extui %27 : i1 to i32
    %c0_i32_18 = arith.constant 0 : i32
    %29 = arith.cmpi ne, %28, %c0_i32_18 : i32
    scf.if %29 {
      %c0_19 = arith.constant 0 : index
      %c0_20 = arith.constant 0 : index
      %30 = vector.load %arg11[%c0_19, %c0_20] : memref<16x128xf32, #tpu.memory_space<vmem>>, vector<16x128xf32>
      %c0_21 = arith.constant 0 : index
      %c0_22 = arith.constant 0 : index
      %31 = vector.load %arg8[%c0_21, %c0_22] : memref<1x128xf32, #tpu.memory_space<vmem>>, vector<1x128xf32>
      %32 = vector.broadcast %31 : vector<1x128xf32> to vector<16x128xf32>
      %33 = arith.addf %30, %32 : vector<16x128xf32>
      %c0_23 = arith.constant 0 : index
      %c0_24 = arith.constant 0 : index
      %34 = vector.load %arg2[%c0_23, %c0_24] : memref<16x128xf32, #tpu.memory_space<vmem>>, vector<16x128xf32>
      %35 = arith.addf %33, %34 : vector<16x128xf32>
      %c0_25 = arith.constant 0 : index
      %c0_26 = arith.constant 0 : index
      %36 = vector.load %arg9[%c0_25, %c0_26] : memref<16x128xf32, #tpu.memory_space<vmem>>, vector<16x128xf32>
      tpu.vector_store %arg9[%c0_25, %c0_26], %35 {strides = array<i32>} : memref<16x128xf32, #tpu.memory_space<vmem>>, vector<16x128xf32>,
    } else {
    }
    return
  }
  func.func @transform_0(%arg0: i32, %arg1: i32) -> (i32, i32) {
    %c0_i32 = arith.constant 0 : i32
    %c0_i32_0 = arith.constant 0 : i32
    return %arg0, %c0_i32 : i32, i32
  }
  func.func @transform_1(%arg0: i32, %arg1: i32) -> (i32, i32) {
    %c0_i32 = arith.constant 0 : i32
    %c0_i32_0 = arith.constant 0 : i32
    %c0_i32_1 = arith.constant 0 : i32
    return %c0_i32, %c0_i32_0 : i32, i32
  }
  func.func @transform_2(%arg0: i32, %arg1: i32) -> (i32, i32) {
    %c0_i32 = arith.constant 0 : i32
    %c0_i32_0 = arith.constant 0 : i32
    %c0_i32_1 = arith.constant 0 : i32
    return %c0_i32, %c0_i32_0 : i32, i32
  }
  func.func @transform_3(%arg0: i32, %arg1: i32) -> (i32, i32) {
    %c0_i32 = arith.constant 0 : i32
    %c0_i32_0 = arith.constant 0 : i32
    return %c0_i32, %arg1 : i32, i32
  }
  func.func @transform_4(%arg0: i32, %arg1: i32) -> (i32, i32) {
    %c0_i32 = arith.constant 0 : i32
    %c0_i32_0 = arith.constant 0 : i32
    return %c0_i32, %arg1 : i32, i32
  }
  func.func @transform_5(%arg0: i32, %arg1: i32) -> (i32, i32) {
    %c0_i32 = arith.constant 0 : i32
    %c0_i32_0 = arith.constant 0 : i32
    return %arg1, %c0_i32 : i32, i32
  }
  func.func @transform_6(%arg0: i32, %arg1: i32) -> (i32, i32) {
    %c0_i32 = arith.constant 0 : i32
    %c0_i32_0 = arith.constant 0 : i32
    %c0_i32_1 = arith.constant 0 : i32
    return %c0_i32, %c0_i32_0 : i32, i32
  }
  func.func @transform_7(%arg0: i32, %arg1: i32) -> (i32, i32) {
    %c0_i32 = arith.constant 0 : i32
    %c0_i32_0 = arith.constant 0 : i32
    return %arg0, %c0_i32 : i32, i32
  }
}

</mosaic_0001>

<bundles_post_ra>
// kernel: tpu_custom_call.1
= control target key start
LH: loop header
LB: loop body
LE: loop exit
PB: predicated region body
PF: predicated region fallthrough
CT: control target
= control target key end

     0   :  { %12 = vsyncpa [#allocation5], 0  ;;  %s665_s0 = inlined_call_operand.hbm [shape: f32[16,128], index: 0, kind: input, shape index: {}]   ;;  %s666_s1 = inlined_call_operand.hbm [shape: f32[1,128], index: 1, kind: input, shape index: {}]   ;;  %s667_s2 = inlined_call_operand.vmem [shape: f32[1,128], index: 2, kind: input, shape index: {}]   ;;  %s668_s3 = inlined_call_operand.hbm [shape: f32[128,256], index: 3, kind: input, shape index: {}]   ;;  %s669_s4 = inlined_call_operand.vmem [shape: f32[1,256], index: 4, kind: input, shape index: {}]   ;;  %s670_s5 = inlined_call_operand.hbm [shape: f32[256,128], index: 5, kind: input, shape index: {}]   ;;  %s671_s6 = inlined_call_operand.vmem [shape: f32[1,128], index: 6, kind: input, shape index: {}]   ;;  %s672_s7 = inlined_call_operand.hbm [shape: f32[16,128], index: 7, kind: output, shape index: {}]  }
   0x1   :  { %13 = vsyncpa [#allocation8], 0 }
   0x2   :  { %14 = vsyncpa [#allocation11], 0  ;;  %s34_s26 = sshll.u32 %s666_s1, 4  ;;  %s35_s26 = int_to_ptr.hbm [resolvable:$true] %s34_s26 }
   0x3   :  { %15 = vsyncpa [#allocation6], 0  ;;  %s556_s27 = smov [#allocation7]   ;;  %s20_s8 = sshll.u32 %s665_s0, 4  ;;  %s21_s8 = int_to_ptr.hbm [resolvable:$true] %s20_s8 }
   0x4   :  { %s36_s28 = sshll.u32 %s556_s27, 4  ;;  %s557_s9 = smov [#allocation4]   ;;  %s37_s28 = int_to_ptr.vmem [resolvable:$true] %s36_s28 }
   0x5   :  { %39 = dma.hbm_to_vmem [thread:$0]  %s35_s26, 16, %s37_s28, [#allocation8]  }
   0x6   :  { %s22_s10 = sshll.u32 %s557_s9, 4  ;;  %s558_s11 = smov 128   ;;  %s23_s10 = int_to_ptr.vmem [resolvable:$true] %s22_s10 }
   0x7   :  { %s559_s12 = smov 8   ;;  %s46_s14 = sshll.u32 %s668_s3, 4  ;;  %s47_s14 = int_to_ptr.hbm [resolvable:$true] %s46_s14 }
   0x8   :  { %28 = dma.hbm_to_vmem [thread:$0]  %s21_s8, 256, %s23_s10, [#allocation5], %s558_s11, %s558_s11, %s559_s12  }
   0x9   :  { %s560_s15 = smov [#allocation9]   ;;  %s61_s18 = sshll.u32 %s670_s5, 4  ;;  %s62_s18 = int_to_ptr.hbm [resolvable:$true] %s61_s18 }
   0xa   :  { %s48_s16 = sshll.u32 %s560_s15, 4  ;;  %s561_s19 = smov 256   ;;  %s49_s16 = int_to_ptr.vmem [resolvable:$true] %s48_s16 }
   0xb   :  { %s562_s20 = smov 16   ;;  %s563_s21 = smov [#allocation10]  }
   0xc   :  { %54 = dma.hbm_to_vmem [thread:$0]  %s47_s14, 4096, %s49_s16, [#allocation8], %s561_s19, %s561_s19, %s562_s20  }
   0xd   :  { %s63_s22 = sshll.u32 %s563_s21, 4  ;;  %s64_s22 = int_to_ptr.vmem [resolvable:$true] %s63_s22 }
   0xe   :  { %69 = dma.hbm_to_vmem [thread:$0]  %s62_s18, 4096, %s64_s22, [#allocation11], %s558_s11, %s558_s11, %s559_s12  }
   0xf   :  { %548 = dma.done.wait [#allocation5], 256  }
  0x10   :  { %549 = vsyncadd [#allocation5], 4294967040 }
  0x11   :  { %550 = dma.done.wait [#allocation8], 4112  }
  0x12   :  { %551 = vsyncadd [#allocation8], 4294963184 }
  0x13   :  { %552 = dma.done.wait [#allocation11], 4096  }
  0x14   :  { %553 = vsyncadd [#allocation11], 4294963200  ;;  %v624_v0 = vld [vmem:[#allocation4] sm:$0xff]  ;;  %v627_v1 = vld [vmem:[#allocation4 + $0x8] sm:$0xff]  ;;  %v564_v2 = vmov 128.0   ;;  %s565_s25 = smov [#allocation12]  }
  0x15   :  { %94 = vadd.xlane.f32.xlu0 %v624_v0  ;;  %414 = vrcp.f32 %v564_v2  ;;  %v189_v5 = vld [vmem:[#allocation9 + $0xf0] sm:$0xff]  ;;  %v190_v6 = vld [vmem:[#allocation9 + $0xf8] sm:$0xff]  ;;  %v187_v7 = vld [vmem:[#allocation9 + $0xe0] sm:$0xff]  ;;  %s384_s26 = sshll.u32 %s565_s25, 4  ;;  %s386_s29 = sshll.u32 %s672_s7, 4  ;;  %s385_s26 = int_to_ptr.vmem [resolvable:$true] %s384_s26  ;;  %s387_s29 = int_to_ptr.hbm [resolvable:$true] %s386_s29 }
  0x16   :  { %197 = vmatpush.msra.mxu0 %v189_v5  ;;  %220 = vmatpush.msra.mxu1 %v190_v6  ;;  %v188_v8 = vld [vmem:[#allocation9 + $0xe8] sm:$0xff]  ;;  %v185_v21 = vld [vmem:[#allocation9 + $0xd0] sm:$0xff]  ;;  %v186_v22 = vld [vmem:[#allocation9 + $0xd8] sm:$0xff] }
  0x17   :  { %v183_v23 = vld [vmem:[#allocation9 + $0xc0] sm:$0xff]  ;;  %v184_v24 = vld [vmem:[#allocation9 + $0xc8] sm:$0xff]  ;;  %v181_v25 = vld [vmem:[#allocation9 + $0xb0] sm:$0xff] }
  0x18   :  { %198 = vmatpush.msra.mxu0 %v187_v7  ;;  %221 = vmatpush.msra.mxu1 %v188_v8  ;;  %v182_v26 = vld [vmem:[#allocation9 + $0xb8] sm:$0xff]  ;;  %v179_v27 = vld [vmem:[#allocation9 + $0xa0] sm:$0xff]  ;;  %v180_v28 = vld [vmem:[#allocation9 + $0xa8] sm:$0xff] }
  0x19   :  { %v177_v29 = vld [vmem:[#allocation9 + $0x90] sm:$0xff]  ;;  %v178_v30 = vld [vmem:[#allocation9 + $0x98] sm:$0xff]  ;;  %v175_v31 = vld [vmem:[#allocation9 + $0x80] sm:$0xff] }
  0x1a   :  { %199 = vmatpush.msra.mxu0 %v185_v21  ;;  %222 = vmatpush.msra.mxu1 %v186_v22  ;;  %v176_v32 = vld [vmem:[#allocation9 + $0x88] sm:$0xff]  ;;  %v173_v33 = vld [vmem:[#allocation9 + $0x70] sm:$0xff]  ;;  %v174_v34 = vld [vmem:[#allocation9 + $0x78] sm:$0xff] }
  0x1b   :  { %v415_v3 = vpop.eup %414  ;;  %v171_v35 = vld [vmem:[#allocation9 + $0x60] sm:$0xff]  ;;  %v172_v36 = vld [vmem:[#allocation9 + $0x68] sm:$0xff]  ;;  %v169_v37 = vld [vmem:[#allocation9 + $0x50] sm:$0xff] }
  0x1c   :  { %v99_v4 = vmul.f32 128.0, %v415_v3  ;;  %vm103_vm0 = vweird.f32 %v415_v3  ;;  %200 = vmatpush.msra.mxu0 %v183_v23  ;;  %223 = vmatpush.msra.mxu1 %v184_v24  ;;  %v170_v38 = vld [vmem:[#allocation9 + $0x58] sm:$0xff]  ;;  %v167_v39 = vld [vmem:[#allocation9 + $0x40] sm:$0xff]  ;;  %v168_v40 = vld [vmem:[#allocation9 + $0x48] sm:$0xff] }
  0x1d   :  { %96 = vadd.xlane.f32.xlu0 %v627_v1  ;;  %v165_v41 = vld [vmem:[#allocation9 + $0x30] sm:$0xff]  ;;  %v166_v42 = vld [vmem:[#allocation9 + $0x38] sm:$0xff]  ;;  %v163_v43 = vld [vmem:[#allocation9 + $0x20] sm:$0xff] }
  0x1e   :  { %v100_v9 = vsub.f32 1.0, %v99_v4  ;;  %201 = vmatpush.msra.mxu0 %v181_v25  ;;  %224 = vmatpush.msra.mxu1 %v182_v26  ;;  %v164_v44 = vld [vmem:[#allocation9 + $0x28] sm:$0xff]  ;;  %v161_v45 = vld [vmem:[#allocation9 + $0x10] sm:$0xff]  ;;  %v162_v46 = vld [vmem:[#allocation9 + $0x18] sm:$0xff] }
  0x1f   :  { %v159_v47 = vld [vmem:[#allocation9] sm:$0xff]  ;;  %v160_v48 = vld [vmem:[#allocation9 + $0x8] sm:$0xff]  ;;  %v296_v52 = vld [vmem:[#allocation10 + $0x78] sm:$0xff] }
  0x20   :  { %v101_v10 = vmul.f32 %v415_v3, %v100_v9  ;;  %202 = vmatpush.msra.mxu0 %v179_v27  ;;  %225 = vmatpush.msra.mxu1 %v180_v28  ;;  %v312_v53 = vld [vmem:[#allocation10 + $0xf8] sm:$0xff]  ;;  %v295_v54 = vld [vmem:[#allocation10 + $0x70] sm:$0xff]  ;;  %v294_v56 = vld [vmem:[#allocation10 + $0x68] sm:$0xff] }
  0x21   :  { %313 = vmatpush.msra.mxu2 %v296_v52  ;;  %336 = vmatpush.msra.mxu3 %v312_v53  ;;  %v311_v55 = vld [vmem:[#allocation10 + $0xf0] sm:$0xff]  ;;  %v310_v57 = vld [vmem:[#allocation10 + $0xe8] sm:$0xff]  ;;  %v293_v60 = vld [vmem:[#allocation10 + $0x60] sm:$0xff] }
  0x22   :  { %v102_v11 = vadd.f32 %v415_v3, %v101_v10  ;;  %203 = vmatpush.msra.mxu0 %v177_v29  ;;  %226 = vmatpush.msra.mxu1 %v178_v30  ;;  %v309_v61 = vld [vmem:[#allocation10 + $0xe0] sm:$0xff]  ;;  %v411_v9 = vld [vmem:[#allocation7] ss:$0 sm:$0xff]  ;;  %v291_v26 = vld [vmem:[#allocation10 + $0x50] sm:$0xff] }
  0x23   :  { %314 = vmatpush.msra.mxu2 %v295_v54  ;;  %337 = vmatpush.msra.mxu3 %v311_v55  ;;  %v308_v25 = vld [vmem:[#allocation10 + $0xd8] sm:$0xff]  ;;  %v307_v27 = vld [vmem:[#allocation10 + $0xd0] sm:$0xff]  ;;  %v290_v28 = vld [vmem:[#allocation10 + $0x48] sm:$0xff] }
  0x24   :  { %v630_v12 = vsel %vm103_vm0, %v415_v3, %v102_v11  ;;  %204 = vmatpush.msra.mxu0 %v175_v31  ;;  %227 = vmatpush.msra.mxu1 %v176_v32  ;;  %v306_v29 = vld [vmem:[#allocation10 + $0xc8] sm:$0xff]  ;;  %v289_v30 = vld [vmem:[#allocation10 + $0x40] sm:$0xff]  ;;  %v304_v32 = vld [vmem:[#allocation10 + $0xb8] sm:$0xff] }
  0x25   :  { %315 = vmatpush.msra.mxu2 %v294_v56  ;;  %338 = vmatpush.msra.mxu3 %v310_v57  ;;  %v305_v31 = vld [vmem:[#allocation10 + $0xc0] sm:$0xff] }
  0x26   :  { %205 = vmatpush.msra.mxu0 %v173_v33  ;;  %228 = vmatpush.msra.mxu1 %v174_v34  ;;  %v287_v33 = vld [vmem:[#allocation10 + $0x30] sm:$0xff] }
  0x27   :  { %316 = vmatpush.msra.mxu2 %v293_v60  ;;  %339 = vmatpush.msra.mxu3 %v309_v61  ;;  %v303_v34 = vld [vmem:[#allocation10 + $0xb0] sm:$0xff] }
  0x28   :  { %206 = vmatpush.msra.mxu0 %v171_v35  ;;  %229 = vmatpush.msra.mxu1 %v172_v36  ;;  %v286_v35 = vld [vmem:[#allocation10 + $0x28] sm:$0xff] }
  0x29   :  { %340 = vmatpush.msra.mxu3 %v308_v25  ;;  %v302_v36 = vld [vmem:[#allocation10 + $0xa8] sm:$0xff] }
  0x2a   :  { %207 = vmatpush.msra.mxu0 %v169_v37  ;;  %230 = vmatpush.msra.mxu1 %v170_v38  ;;  %v285_v37 = vld [vmem:[#allocation10 + $0x20] sm:$0xff] }
  0x2b   :  { %341 = vmatpush.msra.mxu3 %v307_v27  ;;  %v301_v38 = vld [vmem:[#allocation10 + $0xa0] sm:$0xff] }
  0x2c   :  { %208 = vmatpush.msra.mxu0 %v167_v39  ;;  %231 = vmatpush.msra.mxu1 %v168_v40  ;;  %v284_v39 = vld [vmem:[#allocation10 + $0x18] sm:$0xff] }
  0x2d   :  { %342 = vmatpush.msra.mxu3 %v306_v29  ;;  %v300_v40 = vld [vmem:[#allocation10 + $0x98] sm:$0xff] }
  0x2e   :  { %209 = vmatpush.msra.mxu0 %v165_v41  ;;  %232 = vmatpush.msra.mxu1 %v166_v42  ;;  %v283_v41 = vld [vmem:[#allocation10 + $0x10] sm:$0xff] }
  0x2f   :  { %343 = vmatpush.msra.mxu3 %v305_v31  ;;  %v299_v42 = vld [vmem:[#allocation10 + $0x90] sm:$0xff] }
  0x30   :  { %210 = vmatpush.msra.mxu0 %v163_v43  ;;  %233 = vmatpush.msra.mxu1 %v164_v44  ;;  %v282_v43 = vld [vmem:[#allocation10 + $0x8] sm:$0xff] }
  0x31   :  { %344 = vmatpush.msra.mxu3 %v304_v32  ;;  %v298_v44 = vld [vmem:[#allocation10 + $0x88] sm:$0xff] }
  0x32   :  { %211 = vmatpush.msra.mxu0 %v161_v45  ;;  %234 = vmatpush.msra.mxu1 %v162_v46  ;;  %v281_v45 = vld [vmem:[#allocation10] sm:$0xff] }
  0x33   :  { %345 = vmatpush.msra.mxu3 %v303_v34  ;;  %v297_v46 = vld [vmem:[#allocation10 + $0x80] sm:$0xff] }
  0x34   :  { %212 = vmatpush.msra.mxu0 %v159_v47  ;;  %235 = vmatpush.msra.mxu1 %v160_v48  ;;  %v191_v47 = vld [vmem:[%s669_s4] sm:$0x3] }
  0x35   :  { %346 = vmatpush.msra.mxu3 %v302_v36  ;;  %v193_v48 = vperm.slane %v191_v47, 0 }
  0x37   :  { %347 = vmatpush.msra.mxu3 %v301_v38 }
  0x39   :  { %348 = vmatpush.msra.mxu3 %v300_v40 }
  0x3b   :  { %349 = vmatpush.msra.mxu3 %v299_v42 }
  0x3d   :  { %350 = vmatpush.msra.mxu3 %v298_v44 }
  0x3f   :  { %351 = vmatpush.msra.mxu3 %v297_v46 }
  0x88   :  { %v95_v13 = vpop.xlane.xlu0 %94 }
  0x89   :  { %v105_v14 = vmul.f32 %v630_v12, %v95_v13  ;;  %v412_v13 = vld [vmem:[%s667_s2] ss:$0 sm:$0xff] }
  0x8b   :  { %v634_v15 = vsub.f32 %v624_v0, %v105_v14 }
  0x8d   :  { %v109_v16 = vmul.f32 %v634_v15, %v634_v15 }
  0x8f   :  { %111 = vadd.xlane.f32.xlu1 %v109_v16 }
  0x90   :  { %v97_v17 = vpop.xlane.xlu0 %96 }
  0x91   :  { %v106_v18 = vmul.f32 %v630_v12, %v97_v17 }
  0x93   :  { %v640_v19 = vsub.f32 %v627_v1, %v106_v18 }
  0x95   :  { %v110_v20 = vmul.f32 %v640_v19, %v640_v19 }
  0x97   :  { %113 = vadd.xlane.f32.xlu1 %v110_v20 }
 0x102   :  { %v112_v49 = vpop.xlane.xlu1 %111 }
 0x103   :  { %v115_v50 = vmul.f32 %v112_v49, %v630_v12  ;;  %v194_v49 = vperm.slane %v191_v47, 1 }
 0x105   :  { %v117_v51 = vadd.f32 1e-06, %v115_v50 }
 0x107   :  { %416 = vrsqrt.f32 %v117_v51  ;;  %vm125_vm2 = vweird.f32 %v117_v51 }
 0x10a   :  { %v114_v58 = vpop.xlane.xlu1 %113 }
 0x10b   :  { %v116_v59 = vmul.f32 %v114_v58, %v630_v12 }
 0x10d   :  { %v417_v62 = vpop.eup %416  ;;  %v118_v63 = vadd.f32 1e-06, %v116_v59 }
 0x10e   :  { %v120_v2 = vmul.f32 %v417_v62, %v117_v51  ;;  %vm126_vm1 = vweird.f32 %v417_v62 }
 0x10f   :  { %418 = vrsqrt.f32 %v118_v63  ;;  %vm127_vm3 = vmor %vm125_vm2, %vm126_vm1  ;;  %vm135_vm5 = vweird.f32 %v118_v63 }
 0x110   :  { %v121_v3 = vmul.f32 %v417_v62, %v120_v2 }
 0x112   :  { %v122_v4 = vmul.f32 0.5, %v121_v3 }
 0x114   :  { %v123_v5 = vsub.f32 1.5, %v122_v4 }
 0x115   :  { %v419_v6 = vpop.eup %418 }
 0x116   :  { %v124_v7 = vmul.f32 %v417_v62, %v123_v5  ;;  %v130_v8 = vmul.f32 %v419_v6, %v118_v63  ;;  %vm136_vm4 = vweird.f32 %v419_v6 }
 0x117   :  { %vm137_vm6 = vmor %vm135_vm5, %vm136_vm4 }
 0x118   :  { %v131_v10 = vmul.f32 %v419_v6, %v130_v8  ;;  %v128_v11 = vsel %vm127_vm3, %v417_v62, %v124_v7 }
 0x119   :  { %v139_v12 = vmul.f32 %v128_v11, %v634_v15  ;;  %v292_v15 = vld [vmem:[#allocation10 + $0x58] sm:$0xff] }
 0x11a   :  { %v132_v14 = vmul.f32 0.5, %v131_v10  ;;  %317 = vmatpush.msra.mxu2 %v292_v15 }
 0x11b   :  { %v145_v16 = vmul.f32 %v411_v9, %v139_v12 }
 0x11c   :  { %v133_v17 = vsub.f32 1.5, %v132_v14  ;;  %318 = vmatpush.msra.mxu2 %v291_v26 }
 0x11d   :  { %v151_v18 = vadd.f32 %v412_v13, %v145_v16 }
 0x11e   :  { %v134_v20 = vmul.f32 %v419_v6, %v133_v17  ;;  %319 = vmatpush.msra.mxu2 %v290_v28 }
 0x11f   :  { %213 = vmatmul.f32.vlgmr.msra.gmra.mxu0 %v151_v18  ;;  %236 = vmatmul.f32.vlgmr.msra.gmra.mxu1 %v151_v18 }
 0x120   :  { %v138_v21 = vsel %vm137_vm6, %v419_v6, %v134_v20  ;;  %320 = vmatpush.msra.mxu2 %v289_v30 }
 0x121   :  { %v140_v22 = vmul.f32 %v138_v21, %v640_v19  ;;  %v288_v19 = vld [vmem:[#allocation10 + $0x38] sm:$0xff] }
 0x122   :  { %321 = vmatpush.msra.mxu2 %v288_v19 }
 0x123   :  { %v146_v23 = vmul.f32 %v411_v9, %v140_v22 }
 0x124   :  { %322 = vmatpush.msra.mxu2 %v287_v33  ;;  %v413_v33 = vld [vmem:[%s671_s6] ss:$0 sm:$0xff] }
 0x125   :  { %v152_v24 = vadd.f32 %v412_v13, %v146_v23 }
 0x126   :  { %323 = vmatpush.msra.mxu2 %v286_v35 }
 0x127   :  { %216 = vmatmul.f32.gmra.mxu0 %v152_v24  ;;  %239 = vmatmul.f32.gmra.mxu1 %v152_v24 }
 0x128   :  { %324 = vmatpush.msra.mxu2 %v285_v37 }
 0x12a   :  { %325 = vmatpush.msra.mxu2 %v284_v39 }
 0x12c   :  { %326 = vmatpush.msra.mxu2 %v283_v41 }
 0x12e   :  { %327 = vmatpush.msra.mxu2 %v282_v43 }
 0x130   :  { %328 = vmatpush.msra.mxu2 %v281_v45 }
 0x19c   :  { %v214_v50 = vpop.f32.mrf.mxu0  ;;  %v237_v51 = vpop.f32.mrf.mxu1 }
 0x19d   :  { %v215_v52 = vadd.f32 %v214_v50, %v193_v48  ;;  %v238_v53 = vadd.f32 %v237_v51, %v194_v49 }
 0x19f   :  { %v247_v54 = vmul.f32 %v215_v52, %v215_v52  ;;  %v248_v55 = vmul.f32 %v238_v53, %v238_v53  ;;  %v243_v20 = vmul.f32 0.5, %v215_v52  ;;  %v244_v22 = vmul.f32 0.5, %v238_v53 }
 0x1a1   :  { %v251_v56 = vmul.f32 0.044715, %v247_v54  ;;  %v252_v57 = vmul.f32 0.044715, %v248_v55 }
 0x1a3   :  { %v255_v58 = vmul.f32 %v251_v56, %v215_v52  ;;  %v256_v59 = vmul.f32 %v252_v57, %v238_v53 }
 0x1a4   :  { %v217_v60 = vpop.f32.mrf.mxu0  ;;  %v240_v61 = vpop.f32.mrf.mxu1 }
 0x1a5   :  { %v218_v62 = vadd.f32 %v217_v60, %v193_v48  ;;  %v241_v63 = vadd.f32 %v240_v61, %v194_v49  ;;  %v259_v2 = vadd.f32 %v255_v58, %v215_v52  ;;  %v260_v3 = vadd.f32 %v256_v59, %v238_v53 }
 0x1a7   :  { %v249_v4 = vmul.f32 %v218_v62, %v218_v62  ;;  %v250_v5 = vmul.f32 %v241_v63, %v241_v63  ;;  %v263_v6 = vmul.f32 0.7978846, %v259_v2  ;;  %v264_v7 = vmul.f32 0.7978846, %v260_v3 }
 0x1a8   :  { %v245_v27 = vmul.f32 0.5, %v218_v62  ;;  %v246_v29 = vmul.f32 0.5, %v241_v63 }
 0x1a9   :  { %v253_v8 = vmul.f32 0.044715, %v249_v4  ;;  %v254_v9 = vmul.f32 0.044715, %v250_v5  ;;  %420 = vtanh.f32 %v263_v6 }
 0x1aa   :  { %422 = vtanh.f32 %v264_v7 }
 0x1ab   :  { %v257_v10 = vmul.f32 %v253_v8, %v218_v62  ;;  %v258_v11 = vmul.f32 %v254_v9, %v241_v63 }
 0x1ad   :  { %v261_v12 = vadd.f32 %v257_v10, %v218_v62  ;;  %v262_v13 = vadd.f32 %v258_v11, %v241_v63 }
 0x1af   :  { %v421_v14 = vpop.eup %420  ;;  %v265_v16 = vmul.f32 0.7978846, %v261_v12  ;;  %v266_v17 = vmul.f32 0.7978846, %v262_v13 }
 0x1b0   :  { %v423_v18 = vpop.eup %422  ;;  %v271_v21 = vadd.f32 1.0, %v421_v14 }
 0x1b1   :  { %v272_v23 = vadd.f32 1.0, %v423_v18  ;;  %424 = vtanh.f32 %v265_v16 }
 0x1b2   :  { %v275_v24 = vmul.f32 %v271_v21, %v243_v20  ;;  %426 = vtanh.f32 %v266_v17 }
 0x1b3   :  { %v276_v15 = vmul.f32 %v272_v23, %v244_v22 }
 0x1b4   :  { %329 = vmatmul.f32.vlgmr.msra.gmra.mxu2 %v275_v24 }
 0x1b5   :  { %352 = vmatmul.f32.vlgmr.msra.gmra.mxu3 %v276_v15 }
 0x1b7   :  { %v425_v25 = vpop.eup %424 }
 0x1b8   :  { %v427_v26 = vpop.eup %426  ;;  %v273_v28 = vadd.f32 1.0, %v425_v25 }
 0x1b9   :  { %v274_v30 = vadd.f32 1.0, %v427_v26 }
 0x1ba   :  { %v277_v31 = vmul.f32 %v273_v28, %v245_v27 }
 0x1bb   :  { %v278_v19 = vmul.f32 %v274_v30, %v246_v29 }
 0x1bc   :  { %332 = vmatmul.f32.gmra.mxu2 %v277_v31 }
 0x1bd   :  { %355 = vmatmul.f32.gmra.mxu3 %v278_v19 }
 0x237   :  { %v330_v32 = vpop.f32.mrf.mxu2 }
 0x238   :  { %v353_v34 = vpop.f32.mrf.mxu3 }
 0x239   :  { %v354_v35 = vadd.f32 %v353_v34, %v330_v32 }
 0x23b   :  { %v372_v36 = vadd.f32 %v413_v33, %v354_v35 }
 0x23d   :  { %v376_v37 = vadd.f32 %v372_v36, %v624_v0 }
 0x23f   :  { %378 = vst [vmem:[#allocation12] sm:$0xff] %v376_v37  ;;  %v333_v38 = vpop.f32.mrf.mxu2 }
 0x240   :  { %v356_v39 = vpop.f32.mrf.mxu3 }
 0x241   :  { %v357_v40 = vadd.f32 %v356_v39, %v333_v38 }
 0x243   :  { %v373_v41 = vadd.f32 %v413_v33, %v357_v40 }
 0x245   :  { %v377_v42 = vadd.f32 %v373_v41, %v627_v1 }
 0x247   :  { %379 = vst [vmem:[#allocation12 + $0x8] sm:$0xff] %v377_v42 }
 0x248   :  { %392 = dma.vmem_to_hbm [thread:$0]  %s385_s26, 256, %s387_s29, [#allocation6], %s558_s11, %s558_s11, %s559_s12  }
 0x249   :  { %554 = dma.done.wait [#allocation6], 256  }
 0x24a   :  { %555 = vsyncadd [#allocation6], 4294967040 }
 0x24b   :  { %397 = vsyncpa [#allocation5], 1 }
 0x24c   :  { %398 = vsyncpa [#allocation8], 1 }
 0x24d   :  { %399 = vsyncpa [#allocation11], 1 }
 0x24e   :  { %400 = vsyncpa [#allocation6], 1 }

</bundles_post_ra>
